<compile_context>
chip_gen: v6e
topology: v6e:2x2x1
jax: 0.10.0
libtpu: 0.0.40
codegen_flags: <defaults>
</compile_context>

<pallas_src>
import math

import jax
import jax.numpy as jnp
import numpy as np
from jax import lax
from jax.experimental import pallas as pl
from jax.experimental.pallas import tpu as pltpu


# Batched score contraction: (tb, tq, H) x (tb, tk, H) -> (tb, tq, tk),
# contracting the hidden dim directly (no .T -> no XLU transpose per step).
_SCORE_DIMS = (((2,), (2,)), ((0,), (0,)))


# ---------------------------------------------------------------------------
# Kernels (blocks: q (tb, tq, H), k (tb, tk, H), out (tb, tq, tk))
# ---------------------------------------------------------------------------
def _dot_kernel(q_ref, k_ref, o_ref):
    s = lax.dot_general(q_ref[...], k_ref[...], _SCORE_DIMS,
                        preferred_element_type=jnp.float32)
    o_ref[...] = s.astype(o_ref.dtype)


def _general_kernel(q_ref, k_ref, w_ref, b_ref, o_ref):
    # torch: scores = Q @ (K @ W^T + b)^T
    # transpose-free, algebraically identical form:
    #        scores = (Q @ W) @ K^T + (Q @ b)[..., None]
    tb, tq, h = q_ref.shape
    q2 = q_ref[...].reshape(tb * tq, h)            # merge major dims (layout-free)
    qw = jnp.dot(q2, w_ref[...], preferred_element_type=jnp.float32)         # (tb*tq, H)
    qb = lax.dot_general(q2, b_ref[...], (((1,), (1,)), ((), ())),
                         preferred_element_type=jnp.float32)                 # (tb*tq, 1)
    s = lax.dot_general(qw.astype(k_ref.dtype).reshape(tb, tq, h),
                        k_ref[...], _SCORE_DIMS,
                        preferred_element_type=jnp.float32)                  # (tb, tq, tk)
    o_ref[...] = (s + qb.reshape(tb, tq, 1)).astype(o_ref.dtype)


def _bilinear_kernel(q_ref, k_ref, w_ref, o_ref):
    # torch: scores = (Q @ W) @ K^T
    tb, tq, h = q_ref.shape
    q2 = q_ref[...].reshape(tb * tq, h)
    qw = jnp.dot(q2, w_ref[...], preferred_element_type=jnp.float32)
    s = lax.dot_general(qw.astype(k_ref.dtype).reshape(tb, tq, h),
                        k_ref[...], _SCORE_DIMS,
                        preferred_element_type=jnp.float32)
    o_ref[...] = s.astype(o_ref.dtype)


# ---------------------------------------------------------------------------
# Tiling helpers / wrapper
# ---------------------------------------------------------------------------
def _pick_tile(dim, preferred, align):
    """Largest tile <= preferred that evenly divides `dim` and is a multiple
    of `align`; falls back to the full dim (which is always a legal block)."""
    if dim <= preferred:
        return dim
    start = preferred - preferred % align
    for t in range(start, 0, -align):
        if dim % t == 0:
            return t
    return dim  # no aligned divisor: don't tile this axis


def attention(query, key, style="dot", weight=None, bias=None,
              *, tq_pref=256, tk_pref=256):
    """Pallas TPU implementation of `Attention.forward`.

    query: (B, Lq, H), key: (B, Lk, H)  ->  (B, Lq, Lk)
    """
    style = style.lower()
    B, Lq, H = query.shape
    Bk, Lk, Hk = key.shape
    assert B == Bk and H == Hk
    itemsize = jnp.dtype(query.dtype).itemsize

    # --- tiling -------------------------------------------------------------
    # Tiles <= ~256 keep (q + k + out blocks) x 2 pipeline buffers far below
    # v7x's 64 MiB physical VMEM while staying MXU-edge friendly.
    tq = _pick_tile(Lq, tq_pref, 8)      # sublane axis of q / out blocks
    tk = _pick_tile(Lk, tk_pref, 128)    # lane axis of the out block
    # For tiny (Lq, Lk) problems, group several batch elements per grid step
    # so the ~0.35us per-grid-step overhead is amortized over real work.
    tb = 1
    if tq == Lq and tk == Lk and B > 1 and Lq * Lk < 256 * 256:
        per_batch_bytes = (Lq * H + Lk * H + Lq * Lk) * itemsize
        tb_cap = max(1, min((256 * 256) // max(Lq * Lk, 1),
                            (8 << 20) // max(per_batch_bytes, 1)))
        tb = _pick_tile(B, tb_cap, 1)
    # TODO(synk): for very large H add a reduction grid axis over H with an
    # f32 VMEM accumulator (pl.when init/store); here H is loaded whole.

    grid = (B // tb, pl.cdiv(Lq, tq), pl.cdiv(Lk, tk))

    q_spec = pl.BlockSpec((tb, tq, H), lambda b, i, j: (b, i, 0))
    k_spec = pl.BlockSpec((tb, tk, H), lambda b, i, j: (b, j, 0))
    o_spec = pl.BlockSpec((tb, tq, tk), lambda b, i, j: (b, i, j))
    w_spec = pl.BlockSpec((H, H), lambda b, i, j: (0, 0))
    b_spec = pl.BlockSpec((1, H), lambda b, i, j: (0, 0))

    out_shape = jax.ShapeDtypeStruct((B, Lq, Lk), query.dtype)

    # --- VMEM budget (blocks are double-buffered) -----------------------------
    blk_bytes = (tb * tq * H + tb * tk * H + tb * tq * tk) * itemsize
    if weight is not None:
        blk_bytes += (H * H + H) * jnp.dtype(weight.dtype).itemsize
    vmem_bytes = int(min(max(2 * blk_bytes + (8 << 20), 32 << 20), 48 << 20))

    cparams = pltpu.CompilerParams(
        dimension_semantics=("parallel", "parallel", "parallel"),
        vmem_limit_bytes=vmem_bytes,
    )

    if style == "dot":
        grid_spec = pltpu.PrefetchScalarGridSpec(
            num_scalar_prefetch=0, grid=grid,
            in_specs=[q_spec, k_spec], out_specs=o_spec)
        return pl.pallas_call(_dot_kernel, out_shape=out_shape,
                              grid_spec=grid_spec,
                              compiler_params=cparams)(query, key)

    elif style == "general":
        assert weight is not None and bias is not None
        bias2d = bias.reshape(1, H)
        grid_spec = pltpu.PrefetchScalarGridSpec(
            num_scalar_prefetch=0, grid=grid,
            in_specs=[q_spec, k_spec, w_spec, b_spec], out_specs=o_spec)
        return pl.pallas_call(_general_kernel, out_shape=out_shape,
                              grid_spec=grid_spec,
                              compiler_params=cparams)(query, key, weight, bias2d)

    elif style == "bilinear":
        assert weight is not None
        grid_spec = pltpu.PrefetchScalarGridSpec(
            num_scalar_prefetch=0, grid=grid,
            in_specs=[q_spec, k_spec, w_spec], out_specs=o_spec)
        return pl.pallas_call(_bilinear_kernel, out_shape=out_shape,
                              grid_spec=grid_spec,
                              compiler_params=cparams)(query, key, weight)

    else:
        # TODO(synk): 'decomposable' references self.transform which is never
        # created for that style in the PyTorch __init__ (it would raise
        # AttributeError), so it is not implemented here.
        raise ValueError(f"unsupported alignment_network style: {style}")


# ---------------------------------------------------------------------------
# Pure-JAX references (mirror the PyTorch forward directly, so the algebraic
# rewrite of the 'general' path is verified against the original form).
# ---------------------------------------------------------------------------
def _ref_dot(q, k):
    return jnp.einsum("bqh,bkh->bqk", q, k)


def _ref_general(q, k, w, b):
    kt = jnp.einsum("bkh,oh->bko", k, w) + b       # nn.Linear: K @ W^T + b
    return jnp.einsum("bqh,bkh->bqk", q, kt)


def _ref_bilinear(q, k, w):
    return jnp.einsum("bqh,hj,bkj->bqk", q, w, k)


if __name__ == "__main__":
    # Small shapes consistent with the module (batch=2, seq=8, hidden=32).
    B, Lq, Lk, H = 2, 8, 8, 32

    key0 = jax.random.PRNGKey(0)
    kq, kk, kw, kb, kwb, kq2, kk2 = jax.random.split(key0, 7)

    query = jax.random.normal(kq, (B, Lq, H), dtype=jnp.float32)
    key_t = jax.random.normal(kk, (B, Lk, H), dtype=jnp.float32)

    # Deterministic parameter init mirroring PyTorch shapes:
    #  - 'general': nn.Linear(H, H) -> weight (H, H), bias (H,)
    #  - 'bilinear': weight (H, H) ~ U(-1/sqrt(H), 1/sqrt(H))
    stdv = 1.0 / math.sqrt(H)
    lin_w = jax.random.uniform(kw, (H, H), minval=-stdv, maxval=stdv,
                               dtype=jnp.float32)
    lin_b = jax.random.uniform(kb, (H,), minval=-stdv, maxval=stdv,
                               dtype=jnp.float32)
    bil_w = jax.random.uniform(kwb, (H, H), minval=-stdv, maxval=stdv,
                               dtype=jnp.float32)

    # dot (default style of the module)
    out_dot = jax.block_until_ready(attention(query, key_t, style="dot"))
    np.testing.assert_allclose(np.asarray(out_dot),
                               np.asarray(_ref_dot(query, key_t)),
                               rtol=1e-4, atol=1e-4)

    # general
    out_gen = jax.block_until_ready(
        attention(query, key_t, style="general", weight=lin_w, bias=lin_b))
    np.testing.assert_allclose(np.asarray(out_gen),
                               np.asarray(_ref_general(query, key_t, lin_w, lin_b)),
                               rtol=1e-4, atol=1e-4)

    # bilinear
    out_bil = jax.block_until_ready(
        attention(query, key_t, style="bilinear", weight=bil_w))
    np.testing.assert_allclose(np.asarray(out_bil),
                               np.asarray(_ref_bilinear(query, key_t, bil_w)),
                               rtol=1e-4, atol=1e-4)

    # Smoke-test the tiled path (grid = (2, 2, 2) with 256x256 score tiles).
    B2, L2, H2 = 2, 512, 128
    q_big = jax.random.normal(kq2, (B2, L2, H2), dtype=jnp.float32)
    k_big = jax.random.normal(kk2, (B2, L2, H2), dtype=jnp.float32)
    out_big = jax.block_until_ready(attention(q_big, k_big, style="dot"))
    np.testing.assert_allclose(np.asarray(out_big),
                               np.asarray(_ref_dot(q_big, k_big)),
                               rtol=1e-4, atol=1e-4)

    assert out_dot.shape == (B, Lq, Lk)
    print("KERNEL_OK")
</pallas_src>

<mosaic_0001>
module attributes {stable_mosaic.version = 11 : i64} {
  func.func @_dot_kernel(%arg0: i32, %arg1: i32, %arg2: i32, %arg3: memref<2x8x32xf32, #tpu.memory_space<vmem>>, %arg4: memref<2x8x32xf32, #tpu.memory_space<vmem>>, %arg5: memref<2x8x8xf32, #tpu.memory_space<vmem>>) attributes {dimension_semantics = [#tpu.dimension_semantics<parallel>, #tpu.dimension_semantics<parallel>, #tpu.dimension_semantics<parallel>], iteration_bounds = array<i64: 1, 1, 1>, scalar_prefetch = 0 : i64, scratch_operands = 0 : i64, tpu.core_type = #tpu.core_type<tc>, window_params = [{transform_indices = @transform_0, window_bounds = array<i64: 2, 8, 32>}, {transform_indices = @transform_1, window_bounds = array<i64: 2, 8, 32>}, {transform_indices = @transform_2, window_bounds = array<i64: 2, 8, 8>}]} {
    %c0 = arith.constant 0 : index
    %c0_0 = arith.constant 0 : index
    %c0_1 = arith.constant 0 : index
    %0 = vector.load %arg3[%c0, %c0_0, %c0_1] : memref<2x8x32xf32, #tpu.memory_space<vmem>>, vector<2x8x32xf32>
    %c0_2 = arith.constant 0 : index
    %c0_3 = arith.constant 0 : index
    %c0_4 = arith.constant 0 : index
    %1 = vector.load %arg4[%c0_2, %c0_3, %c0_4] : memref<2x8x32xf32, #tpu.memory_space<vmem>>, vector<2x8x32xf32>
    %cst = arith.constant dense<0.000000e+00> : vector<2x8x8xf32>
    %2 = tpu.matmul %0, %1, %cst {dimension_numbers = #tpu.dot_dimension_numbers<[2], [2], [1], [1], [0, 0, 0, 1, 1, 1], [0], [0]>} : vector<2x8x32xf32>, vector<2x8x32xf32>, vector<2x8x8xf32> -> vector<2x8x8xf32>
    %c0_5 = arith.constant 0 : index
    %c0_6 = arith.constant 0 : index
    %c0_7 = arith.constant 0 : index
    %3 = vector.load %arg5[%c0_5, %c0_6, %c0_7] : memref<2x8x8xf32, #tpu.memory_space<vmem>>, vector<2x8x8xf32>
    tpu.vector_store %arg5[%c0_5, %c0_6, %c0_7], %2 {strides = array<i32>} : memref<2x8x8xf32, #tpu.memory_space<vmem>>, vector<2x8x8xf32>,
    return
  }
  func.func @transform_0(%arg0: i32, %arg1: i32, %arg2: i32) -> (i32, i32, i32) {
    %c0_i32 = arith.constant 0 : i32
    %c0_i32_0 = arith.constant 0 : i32
    return %arg0, %arg1, %c0_i32 : i32, i32, i32
  }
  func.func @transform_1(%arg0: i32, %arg1: i32, %arg2: i32) -> (i32, i32, i32) {
    %c0_i32 = arith.constant 0 : i32
    %c0_i32_0 = arith.constant 0 : i32
    return %arg0, %arg2, %c0_i32 : i32, i32, i32
  }
  func.func @transform_2(%arg0: i32, %arg1: i32, %arg2: i32) -> (i32, i32, i32) {
    %c0_i32 = arith.constant 0 : i32
    return %arg0, %arg1, %arg2 : i32, i32, i32
  }
}

</mosaic_0001>

<bundles_post_ra>
// kernel: tpu_custom_call.1
= control target key start
LH: loop header
LB: loop body
LE: loop exit
PB: predicated region body
PF: predicated region fallthrough
CT: control target
= control target key end

     0   :  { %7 = vsyncpa [#allocation3], 0  ;;  %s349_s0 = inlined_call_operand.hbm [shape: f32[2,8,32], index: 0, kind: input, shape index: {}]   ;;  %s350_s1 = inlined_call_operand.hbm [shape: f32[2,8,32], index: 1, kind: input, shape index: {}]   ;;  %s351_s2 = inlined_call_operand.hbm [shape: f32[2,8,8], index: 2, kind: output, shape index: {}]  }
   0x1   :  { %8 = vsyncpa [#allocation6], 0 }
   0x2   :  { %9 = vsyncpa [#allocation4], 0  ;;  %s309_s9 = smov [#allocation2]  }
   0x3   :  { %s15_s10 = sshll.u32 %s309_s9, 4  ;;  %s16_s10 = int_to_ptr.vmem [resolvable:$true] %s15_s10 }
   0x4   :  { %s251_s11 = scalar_lea.vmem %s16_s10, 256  ;;  %p256_p1 = scmp.lt.s32.totalorder %s16_s10, %s16_s10 }
   0x5   :  { %p252_p0 = scmp.ne.s32.totalorder %s16_s10, %s251_s11  ;;  %p257_p2 = scmp.lt.s32.totalorder %s251_s11, %s251_s11 }
   0x7   :  { %p258_p3 = por %p257_p2, %p256_p1 }
   0x9   :  { %p259_p4 = pnand %p258_p3, %p252_p0 }
   0xb   :  { %262 = shalt.err (!%p259_p4)
}
   0xc   :  { %s310_s12 = smov 128   ;;  %s311_s13 = smov 8  }
   0xd   :  { %21 = dma.hbm_to_vmem [thread:$0]  %s349_s0, 256, %s16_s10, [#allocation3], %s310_s12, %s310_s12, %s311_s13  }
   0xe   :  { %s312_s16 = smov [#allocation5]  }
   0xf   :  { %s27_s17 = sshll.u32 %s312_s16, 4  ;;  %s28_s17 = int_to_ptr.vmem [resolvable:$true] %s27_s17 }
  0x10   :  { %s271_s18 = scalar_lea.vmem %s28_s17, 256  ;;  %p276_p6 = scmp.lt.s32.totalorder %s28_s17, %s28_s17 }
  0x11   :  { %p272_p5 = scmp.ne.s32.totalorder %s28_s17, %s271_s18  ;;  %p277_p7 = scmp.lt.s32.totalorder %s271_s18, %s271_s18 }
  0x13   :  { %p278_p8 = por %p277_p7, %p276_p6 }
  0x15   :  { %p279_p9 = pnand %p278_p8, %p272_p5 }
  0x17   :  { %282 = shalt.err (!%p279_p9)
}
  0x18   :  { %33 = dma.hbm_to_vmem [thread:$0]  %s350_s1, 256, %s28_s17, [#allocation6], %s310_s12, %s310_s12, %s311_s13  }
  0x19   :  { %303 = dma.done.wait [#allocation3], 256  }
  0x1a   :  { %304 = vsyncadd [#allocation3], 4294967040 }
  0x1b   :  { %305 = dma.done.wait [#allocation6], 256  }
  0x1c   :  { %306 = vsyncadd [#allocation6], 4294967040  ;;  %v313_v0 = vmov 0.0   ;;  %vm314_vm0 = vmmov 0   ;;  %vm44_vm1 = vcmask 261120   ;;  %v42_v1 = vld [vmem:[#allocation5] sm:$0xff] }
  0x1d   :  { %226 = vmatprep.subr.mxu0 %v313_v0  ;;  %231 = vmatprep.subr.mxu1 %v313_v0  ;;  %v43_v2 = vld [vmem:[#allocation5 + $0x8] sm:$0xff]  ;;  %v40_v3 = vld [vmem:[#allocation2] sm:$0xff]  ;;  %v41_v4 = vld [vmem:[#allocation2 + $0x8] sm:$0xff]  ;;  %s315_s0 = smov [#allocation7]   ;;  %vm197_vm2 = vcmask 64512  }
  0x1e   :  { %228 = vmatprep.mubr.msk.f32.mxu0 %vm314_vm0, %v313_v0  ;;  %233 = vmatprep.mubr.msk.f32.mxu1 %vm314_vm0, %v313_v0  ;;  %s205_s1 = sshll.u32 %s315_s0, 4  ;;  %s206_s1 = int_to_ptr.vmem [resolvable:$true] %s205_s1 }
  0x1f   :  { %227 = vmatpush3.xpose.msk.msra.mxu0 %vm44_vm1, %v42_v1  ;;  %232 = vmatpush3.xpose.msk.msra.mxu1 %vm44_vm1, %v43_v2  ;;  %s283_s21 = scalar_lea.vmem %s206_s1, 256  ;;  %p288_p11 = scmp.lt.s32.totalorder %s206_s1, %s206_s1 }
  0x20   :  { %p284_p10 = scmp.ne.s32.totalorder %s206_s1, %s283_s21  ;;  %p289_p12 = scmp.lt.s32.totalorder %s283_s21, %s283_s21 }
  0x22   :  { %229 = vmatmul.mubr.msk.f32.vlgmr.msra.gmra.mxu0 %vm44_vm1, %v40_v3  ;;  %234 = vmatmul.mubr.msk.f32.vlgmr.msra.gmra.mxu1 %vm44_vm1, %v41_v4  ;;  %p290_p13 = por %p289_p12, %p288_p11 }
  0x24   :  { %p291_p0 = pnand %p290_p13, %p284_p10 }
  0xe2   :  { %v117_v5 = vpop.f32.mrf.mxu0  ;;  %v193_v6 = vpop.f32.mrf.mxu1 }
  0xe3   :  { %198 = vst.msk [vmem:[#allocation7] sm:$0xff] %vm197_vm2, %v117_v5  ;;  %199 = vst.msk [vmem:[#allocation7 + $0x8] sm:$0xff] %vm197_vm2, %v193_v6 }
  0xe4   :  { %v230_v7 = vpop.f32.mrf.mxu0  ;;  %v235_v8 = vpop.f32.mrf.mxu1 }
  0xe5   :  { %294 = shalt.err (!%p291_p0)
}
  0xe6   :  { %211 = dma.vmem_to_hbm [thread:$0]  %s206_s1, 256, %s351_s2, [#allocation4], %s310_s12, %s310_s12, %s311_s13  }
  0xe7   :  { %307 = dma.done.wait [#allocation4], 256  }
  0xe8   :  { %308 = vsyncadd [#allocation4], 4294967040 }
  0xe9   :  { %215 = vsyncpa [#allocation3], 1 }
  0xea   :  { %216 = vsyncpa [#allocation6], 1 }
  0xeb   :  { %217 = vsyncpa [#allocation4], 1 }

</bundles_post_ra>
